<compile_context>
chip_gen: v7x
topology: tpu7x:2x2x1
jax: 0.10.0
libtpu: 0.0.40
codegen_flags: <defaults>
</compile_context>

<pallas_src>
import functools

import jax
import jax.numpy as jnp
from jax.experimental import pallas as pl
from jax.experimental.pallas import tpu as pltpu


def _round_up(x: int, m: int) -> int:
    return (x + m - 1) // m * m


def mlp_kernel(x_ref, w1_ref, b1_ref, w2_ref, b2_ref, o_ref):
    # x:  [TB, F]   f32  (cast to bf16 in-kernel on the VPU)
    # w1: [F, Hp]   bf16      b1: [1, Hp] f32
    # w2: [Hp, Ap]  bf16      b2: [1, Ap] f32
    # o:  [TB, Ap]  bf16
    x_bf = x_ref[...].astype(jnp.bfloat16)
    h = jnp.dot(x_bf, w1_ref[...], preferred_element_type=jnp.float32)
    h = jnp.maximum(h + b1_ref[...], 0.0)            # bias + ReLU in f32 (VPU)
    out = jnp.dot(h.astype(jnp.bfloat16), w2_ref[...],
                  preferred_element_type=jnp.float32)
    o_ref[...] = (out + b2_ref[...]).astype(o_ref.dtype)


@functools.partial(jax.jit, static_argnames=("block_b",))
def base_forward(x_nchw, w1, b1, w2, b2, block_b: int = 512):
    """Equivalent of Base.forward: flatten (B, -1) then layers()."""
    B = x_nchw.shape[0]
    x_flat = x_nchw.reshape(B, -1).astype(jnp.float32)   # == x.view(x.size(0), -1)
    F_in = x_flat.shape[1]
    H = w1.shape[1]
    A = w2.shape[1]
    b1 = b1.reshape(1, H)                                 # accept (H,) or (1, H)
    b2 = b2.reshape(1, A)

    # Lane-dense padded weight shapes (zero pad -> semantics unchanged).
    H_pad = _round_up(H, 128)
    A_pad = _round_up(A, 128)

    # Small, reusable padded/cast weights (few hundred KB; x itself is NOT
    # copied -- the kernel reads it as f32 directly).
    w1_p = jnp.zeros((F_in, H_pad), jnp.bfloat16).at[:, :H].set(
        w1.astype(jnp.bfloat16))
    b1_p = jnp.zeros((1, H_pad), jnp.float32).at[:, :H].set(
        b1.astype(jnp.float32))
    w2_p = jnp.zeros((H_pad, A_pad), jnp.bfloat16).at[:H, :A].set(
        w2.astype(jnp.bfloat16))
    b2_p = jnp.zeros((1, A_pad), jnp.float32).at[:, :A].set(
        b2.astype(jnp.float32))

    cost = pl.CostEstimate(
        flops=2 * B * F_in * H_pad + 2 * B * H_pad * A_pad,
        transcendentals=0,
        bytes_accessed=(x_flat.size * 4            # f32 x read
                        + w1_p.size * 2 + w2_p.size * 2
                        + b1_p.size * 4 + b2_p.size * 4
                        + B * A_pad * 2),          # bf16 output write
    )

    B8 = _round_up(B, 8)
    if B8 < 16:
        # Tiny batch: single invocation, no grid, full arrays as one block
        # (block == full dims, so no (8,128) divisibility concern).
        out_pad = pl.pallas_call(
            mlp_kernel,
            out_shape=jax.ShapeDtypeStruct((B, A_pad), jnp.bfloat16),
            cost_estimate=cost,
        )(x_flat, w1_p, b1_p, w2_p, b2_p)
    else:
        # Tiled batch: at least 2 grid steps so v7x's two TensorCores both
        # work; tile capped at block_b. Last block may be partial (masked
        # writes), so no batch padding of x is required.
        tb = min(block_b, _round_up(pl.cdiv(B8, 2), 8))
        grid = pl.cdiv(B, tb)
        out_pad = pl.pallas_call(
            mlp_kernel,
            out_shape=jax.ShapeDtypeStruct((B, A_pad), jnp.bfloat16),
            grid_spec=pltpu.PrefetchScalarGridSpec(
                num_scalar_prefetch=0,
                grid=(grid,),
                in_specs=[
                    pl.BlockSpec((tb, F_in), lambda i: (i, 0)),     # x tile
                    pl.BlockSpec((F_in, H_pad), lambda i: (0, 0)),  # resident
                    pl.BlockSpec((1, H_pad), lambda i: (0, 0)),     # resident
                    pl.BlockSpec((H_pad, A_pad), lambda i: (0, 0)), # resident
                    pl.BlockSpec((1, A_pad), lambda i: (0, 0)),     # resident
                ],
                out_specs=pl.BlockSpec((tb, A_pad), lambda i: (i, 0)),
            ),
            compiler_params=pltpu.CompilerParams(
                dimension_semantics=("parallel",),
            ),
            cost_estimate=cost,
        )(x_flat, w1_p, b1_p, w2_p, b2_p)

    # Slice away the lane padding; return f32 like the torch module would.
    return out_pad[:, :A].astype(jnp.float32)


if __name__ == "__main__":
    # Shapes consistent with the module: input_shape=(C,H,W), num_actions=7
    B, C, H, W = 2, 4, 16, 16
    HIDDEN = 32
    NUM_ACTIONS = 7
    F_IN = C * H * W

    key = jax.random.PRNGKey(0)
    k_x, k_w1, k_b1, k_w2, k_b2, k_xl, k_xr = jax.random.split(key, 7)

    x = jax.random.normal(k_x, (B, C, H, W), dtype=jnp.float32)
    # Deterministic synthetic parameters (nn.Linear-like scale).
    w1 = jax.random.normal(k_w1, (F_IN, HIDDEN), dtype=jnp.float32) * (1.0 / F_IN) ** 0.5
    b1 = jax.random.normal(k_b1, (1, HIDDEN), dtype=jnp.float32) * 0.01
    w2 = jax.random.normal(k_w2, (HIDDEN, NUM_ACTIONS), dtype=jnp.float32) * (1.0 / HIDDEN) ** 0.5
    b2 = jax.random.normal(k_b2, (1, NUM_ACTIONS), dtype=jnp.float32) * 0.01

    def ref_fwd(xin):
        return jnp.maximum(xin.reshape(xin.shape[0], -1) @ w1 + b1, 0.0) @ w2 + b2

    # --- tiny-batch path (B=2, no grid) ---
    out = base_forward(x, w1, b1, w2, b2)
    jax.block_until_ready(out)
    assert out.shape == (B, NUM_ACTIONS)
    # bf16 MXU + bf16 output store -> loose tolerance vs f32 reference.
    assert jnp.allclose(out, ref_fwd(x), atol=5e-2, rtol=5e-2)

    # --- tiled / parallel batch path (even grid: tb=128, 2 steps) ---
    B_LARGE = 256
    x_l = jax.random.normal(k_xl, (B_LARGE, C, H, W), dtype=jnp.float32)
    out_l = base_forward(x_l, w1, b1, w2, b2)
    jax.block_until_ready(out_l)
    assert out_l.shape == (B_LARGE, NUM_ACTIONS)
    assert jnp.allclose(out_l, ref_fwd(x_l), atol=5e-2, rtol=5e-2)

    # --- remainder path (B not a multiple of the tile; partial last block) ---
    B_ODD = 100
    x_r = jax.random.normal(k_xr, (B_ODD, C, H, W), dtype=jnp.float32)
    out_r = base_forward(x_r, w1, b1, w2, b2)
    jax.block_until_ready(out_r)
    assert out_r.shape == (B_ODD, NUM_ACTIONS)
    assert jnp.allclose(out_r, ref_fwd(x_r), atol=5e-2, rtol=5e-2)

    print("KERNEL_OK")
</pallas_src>

<mosaic_0001>
module attributes {stable_mosaic.version = 11 : i64} {
  func.func @mlp_kernel(%arg0: memref<2x1024xf32, #tpu.memory_space<vmem>>, %arg1: memref<1024x128xbf16, #tpu.memory_space<vmem>>, %arg2: memref<1x128xf32, #tpu.memory_space<vmem>>, %arg3: memref<128x128xbf16, #tpu.memory_space<vmem>>, %arg4: memref<1x128xf32, #tpu.memory_space<vmem>>, %arg5: memref<2x128xbf16, #tpu.memory_space<vmem>>) attributes {dimension_semantics = [], scalar_prefetch = 0 : i64, scratch_operands = 0 : i64, tpu.core_type = #tpu.core_type<tc>} {
    %c0 = arith.constant 0 : index
    %c0_0 = arith.constant 0 : index
    %0 = vector.load %arg0[%c0, %c0_0] : memref<2x1024xf32, #tpu.memory_space<vmem>>, vector<2x1024xf32>
    %1 = arith.truncf %0 : vector<2x1024xf32> to vector<2x1024xbf16>
    %c0_1 = arith.constant 0 : index
    %c0_2 = arith.constant 0 : index
    %2 = vector.load %arg1[%c0_1, %c0_2] : memref<1024x128xbf16, #tpu.memory_space<vmem>>, vector<1024x128xbf16>
    %cst = arith.constant dense<0.000000e+00> : vector<2x128xf32>
    %3 = tpu.matmul %1, %2, %cst {dimension_numbers = #tpu.dot_dimension_numbers<[1], [0], [0], [1], [0, 0, 1, 1], [], []>} : vector<2x1024xbf16>, vector<1024x128xbf16>, vector<2x128xf32> -> vector<2x128xf32>
    %c0_3 = arith.constant 0 : index
    %c0_4 = arith.constant 0 : index
    %4 = vector.load %arg2[%c0_3, %c0_4] : memref<1x128xf32, #tpu.memory_space<vmem>>, vector<1x128xf32>
    %5 = vector.broadcast %4 : vector<1x128xf32> to vector<2x128xf32>
    %6 = arith.addf %3, %5 : vector<2x128xf32>
    %cst_5 = arith.constant 0.000000e+00 : f32
    %7 = vector.broadcast %cst_5 : f32 to vector<2x128xf32>
    %8 = arith.maximumf %6, %7 : vector<2x128xf32>
    %9 = arith.truncf %8 : vector<2x128xf32> to vector<2x128xbf16>
    %c0_6 = arith.constant 0 : index
    %c0_7 = arith.constant 0 : index
    %10 = vector.load %arg3[%c0_6, %c0_7] : memref<128x128xbf16, #tpu.memory_space<vmem>>, vector<128x128xbf16>
    %cst_8 = arith.constant dense<0.000000e+00> : vector<2x128xf32>
    %11 = tpu.matmul %9, %10, %cst_8 {dimension_numbers = #tpu.dot_dimension_numbers<[1], [0], [0], [1], [0, 0, 1, 1], [], []>} : vector<2x128xbf16>, vector<128x128xbf16>, vector<2x128xf32> -> vector<2x128xf32>
    %c0_9 = arith.constant 0 : index
    %c0_10 = arith.constant 0 : index
    %12 = vector.load %arg4[%c0_9, %c0_10] : memref<1x128xf32, #tpu.memory_space<vmem>>, vector<1x128xf32>
    %13 = vector.broadcast %12 : vector<1x128xf32> to vector<2x128xf32>
    %14 = arith.addf %11, %13 : vector<2x128xf32>
    %15 = arith.truncf %14 : vector<2x128xf32> to vector<2x128xbf16>
    %c0_11 = arith.constant 0 : index
    %c0_12 = arith.constant 0 : index
    %16 = vector.load %arg5[%c0_11, %c0_12] : memref<2x128xbf16, #tpu.memory_space<vmem>>, vector<2x128xbf16>
    tpu.vector_store %arg5[%c0_11, %c0_12], %15 {strides = array<i32>} : memref<2x128xbf16, #tpu.memory_space<vmem>>, vector<2x128xbf16>,
    return
  }
}

</mosaic_0001>

<bundles_post_ra>
// kernel: base_forward.1
= control target key start
LH: loop header
LB: loop body
LE: loop exit
PB: predicated region body
PF: predicated region fallthrough
CT: control target
= control target key end

     0   :  { %v1141_v22 = vmov 1983009808   ;;  %v29_v24 = vlaneseq  ;;  %vm1143_vm0 = vmmov 0   ;;  %s1417_s1 = inlined_call_operand.vmem [shape: bf16[1024,128], index: 1, kind: input, shape index: {}]   ;;  %s1418_s0 = inlined_call_operand.vmem [shape: f32[2,1024], index: 0, kind: input, shape index: {}]   ;;  %s1419_s3 = inlined_call_operand.vmem [shape: bf16[128,128], index: 3, kind: input, shape index: {}]   ;;  %s1420_s2 = inlined_call_operand.vmem [shape: f32[1,128], index: 2, kind: input, shape index: {}]   ;;  %s1421_s4 = inlined_call_operand.vmem [shape: f32[1,128], index: 4, kind: input, shape index: {}]   ;;  %s1422_s5 = inlined_call_operand.vmem [shape: bf16[2,128], index: 5, kind: output, shape index: {}]  }
   0x1   :  { %v1067_v0 = vld [vmem:[%s1417_s1 + $0x40] sm:$0xff]   ;;  %v1071_v4 = vld [vmem:[%s1417_s1 + $0x48] sm:$0xff]   ;;  %v1075_v8 = vld [vmem:[%s1417_s1 + $0x50] sm:$0xff]   ;;  %v27_v23 = vunpack.c.l.s4 %v1141_v22 }
   0x2   :  { %v1068_v1 = vld [vmem:[%s1417_s1 + $0xc0] sm:$0xff]   ;;  %947 = vmatprep.subr.bf16.mxu0 %v1067_v0  ;;  %v1072_v5 = vld [vmem:[%s1417_s1 + $0xc8] sm:$0xff]   ;;  %v1076_v9 = vld [vmem:[%s1417_s1 + $0xd0] sm:$0xff]   ;;  %v30_v30 = vshrl.u32 %v29_v24, 7 }
   0x3   :  { %v1069_v2 = vld [vmem:[%s1417_s1] sm:$0xff]   ;;  %969 = vmatprep.subr.bf16.mxu1 %v1068_v1  ;;  %v1073_v6 = vld [vmem:[%s1417_s1 + $0x8] sm:$0xff]   ;;  %v1077_v10 = vld [vmem:[%s1417_s1 + $0x10] sm:$0xff]   ;;  %v28_v29 = vunpack.c.0.s8 %v27_v23 }
   0x4   :  { %v1070_v3 = vld [vmem:[%s1417_s1 + $0x80] sm:$0xff]   ;;  %948 = vmatpush3.bf16.msra.mxu0 %v1069_v2  ;;  %v1074_v7 = vld [vmem:[%s1417_s1 + $0x88] sm:$0xff]   ;;  %v1078_v11 = vld [vmem:[%s1417_s1 + $0x90] sm:$0xff]  }
   0x5   :  { %970 = vmatpush3.bf16.msra.mxu1 %v1070_v3  ;;  %949 = vmatprep.subr.bf16.mxu0 %v1071_v4  ;;  %v1079_v12 = vld [vmem:[%s1417_s1 + $0x58] sm:$0xff]   ;;  %v1083_v16 = vld [vmem:[%s1417_s1 + $0x60] sm:$0xff]   ;;  %v1087_v20 = vld [vmem:[%s1417_s1 + $0x68] sm:$0xff]   ;;  %v31_v35 = vsub.s32 %v28_v29, %v30_v30 }
   0x6   :  { %971 = vmatprep.subr.bf16.mxu1 %v1072_v5  ;;  %v1080_v13 = vld [vmem:[%s1417_s1 + $0xd8] sm:$0xff]   ;;  %v1084_v17 = vld [vmem:[%s1417_s1 + $0xe0] sm:$0xff]   ;;  %v1088_v21 = vld [vmem:[%s1417_s1 + $0xe8] sm:$0xff]  }
   0x7   :  { %v1081_v14 = vld [vmem:[%s1417_s1 + $0x18] sm:$0xff]   ;;  %v1085_v18 = vld [vmem:[%s1417_s1 + $0x20] sm:$0xff]   ;;  %v1089_v25 = vld [vmem:[%s1417_s1 + $0x28] sm:$0xff]  }
   0x8   :  { %950 = vmatpush3.bf16.msra.mxu0 %v1073_v6  ;;  %v1082_v15 = vld [vmem:[%s1417_s1 + $0x98] sm:$0xff]   ;;  %v1086_v19 = vld [vmem:[%s1417_s1 + $0xa0] sm:$0xff]   ;;  %v1090_v26 = vld [vmem:[%s1417_s1 + $0xa8] sm:$0xff]  }
   0x9   :  { %972 = vmatpush3.bf16.msra.mxu1 %v1074_v7  ;;  %951 = vmatprep.subr.bf16.mxu0 %v1075_v8  ;;  %v1091_v27 = vld [vmem:[%s1417_s1 + $0x70] sm:$0xff]   ;;  %v1095_v33 = vld [vmem:[%s1417_s1 + $0x78] sm:$0xff]   ;;  %v21_v38 = vld [vmem:[%s1418_s0] sm:$0xff] }
   0xa   :  { %973 = vmatprep.subr.bf16.mxu1 %v1076_v9  ;;  %v1092_v28 = vld [vmem:[%s1417_s1 + $0xf0] sm:$0xff]   ;;  %v1096_v34 = vld [vmem:[%s1417_s1 + $0xf8] sm:$0xff]   ;;  %v22_v39 = vld [vmem:[%s1418_s0 + $0x8] sm:$0xff]  ;;  %v32_v40 = vrot.slane %v21_v38, %v31_v35  ;;  %v25_v42 = vcombine.high %v21_v38, %v21_v38 }
   0xb   :  { %v1093_v31 = vld [vmem:[%s1417_s1 + $0x30] sm:$0xff]   ;;  %v1097_v36 = vld [vmem:[%s1417_s1 + $0x38] sm:$0xff]   ;;  %v42_v41 = vcombine.high %v22_v39, %v22_v39  ;;  %v1101_v43 = vld [vmem:[%s1417_s1 + $0x140] sm:$0xff]   ;;  %v1279_v44 = vrot.slane %v22_v39, %v31_v35 }
   0xc   :  { %952 = vmatpush3.bf16.msra.mxu0 %v1077_v10  ;;  %v1094_v32 = vld [vmem:[%s1417_s1 + $0xb0] sm:$0xff]   ;;  %v1098_v37 = vld [vmem:[%s1417_s1 + $0xb8] sm:$0xff]   ;;  %v1102_v45 = vld [vmem:[%s1417_s1 + $0x1c0] sm:$0xff]   ;;  %v40_v46 = vcombine.high %v32_v40, %v32_v40  ;;  %v39_v47 = vrot.slane %v25_v42, %v31_v35  ;;  %v67_v49 = vpack.c.bf16 %v32_v40, %v32_v40 }
   0xd   :  { %974 = vmatpush3.bf16.msra.mxu1 %v1078_v11  ;;  %953 = vmatprep.subr.bf16.mxu0 %v1079_v12  ;;  %v57_v48 = vcombine.high %v1279_v44, %v1279_v44  ;;  %v1286_v50 = vrot.slane %v42_v41, %v31_v35  ;;  %v1103_v53 = vld [vmem:[%s1417_s1 + $0x100] sm:$0xff]   ;;  %v1105_v55 = vld [vmem:[%s1417_s1 + $0x148] sm:$0xff]   ;;  %v1109_v63 = vld [vmem:[%s1417_s1 + $0x150] sm:$0xff]   ;;  %v71_v24 = vpack.c.bf16 %v1279_v44, %v1279_v44 }
   0xe   :  { %975 = vmatprep.subr.bf16.mxu1 %v1080_v13  ;;  %v68_v51 = vpack.c.bf16 %v40_v46, %v40_v46  ;;  %v41_v52 = vcombine.high %v39_v47, %v39_v47  ;;  %v69_v54 = vpack.c.bf16 %v39_v47, %v39_v47  ;;  %v1104_v58 = vld [vmem:[%s1417_s1 + $0x180] sm:$0xff]   ;;  %v1106_v60 = vld [vmem:[%s1417_s1 + $0x1c8] sm:$0xff]   ;;  %v1110_v1 = vld [vmem:[%s1417_s1 + $0x1d0] sm:$0xff]  }
   0xf   :  { %v58_v56 = vcombine.high %v1286_v50, %v1286_v50  ;;  %v72_v59 = vpack.c.bf16 %v57_v48, %v57_v48  ;;  %v1107_v62 = vld [vmem:[%s1417_s1 + $0x108] sm:$0xff]   ;;  %v1111_v2 = vld [vmem:[%s1417_s1 + $0x110] sm:$0xff]   ;;  %v1113_v3 = vld [vmem:[%s1417_s1 + $0x158] sm:$0xff]  }
  0x10   :  { %954 = vmatpush3.bf16.msra.mxu0 %v1081_v14  ;;  %626 = vmatprep.mubr.bf16.mxu0 %v68_v51  ;;  %v70_v57 = vpack.c.bf16 %v41_v52, %v41_v52  ;;  %v1108_v0 = vld [vmem:[%s1417_s1 + $0x188] sm:$0xff]   ;;  %v1112_v4 = vld [vmem:[%s1417_s1 + $0x190] sm:$0xff]   ;;  %v1114_v5 = vld [vmem:[%s1417_s1 + $0x1d8] sm:$0xff]  }
  0x11   :  { %976 = vmatpush3.bf16.msra.mxu1 %v1082_v15  ;;  %955 = vmatprep.subr.bf16.mxu0 %v1083_v16  ;;  %v74_v61 = vpack.c.bf16 %v58_v56, %v58_v56  ;;  %v1115_v6 = vld [vmem:[%s1417_s1 + $0x118] sm:$0xff]   ;;  %v1117_v7 = vld [vmem:[%s1417_s1 + $0x160] sm:$0xff]   ;;  %v1121_v11 = vld [vmem:[%s1417_s1 + $0x168] sm:$0xff]  }
  0x12   :  { %977 = vmatprep.subr.bf16.mxu1 %v1084_v17  ;;  %666 = vmatprep.mubr.bf16.mxu1 %v70_v57  ;;  %v1116_v8 = vld [vmem:[%s1417_s1 + $0x198] sm:$0xff]   ;;  %v1118_v9 = vld [vmem:[%s1417_s1 + $0x1e0] sm:$0xff]   ;;  %v1122_v13 = vld [vmem:[%s1417_s1 + $0x1e8] sm:$0xff]  }
  0x13   :  { %v1119_v10 = vld [vmem:[%s1417_s1 + $0x120] sm:$0xff]   ;;  %v1123_v14 = vld [vmem:[%s1417_s1 + $0x128] sm:$0xff]   ;;  %v1125_v15 = vld [vmem:[%s1417_s1 + $0x170] sm:$0xff]  }
  0x14   :  { %956 = vmatpush3.bf16.msra.mxu0 %v1085_v18  ;;  %v1120_v12 = vld [vmem:[%s1417_s1 + $0x1a0] sm:$0xff]   ;;  %v1124_v16 = vld [vmem:[%s1417_s1 + $0x1a8] sm:$0xff]   ;;  %v1126_v17 = vld [vmem:[%s1417_s1 + $0x1f0] sm:$0xff]  }
  0x15   :  { %978 = vmatpush3.bf16.msra.mxu1 %v1086_v19  ;;  %957 = vmatprep.subr.bf16.mxu0 %v1087_v20  ;;  %v1127_v18 = vld [vmem:[%s1417_s1 + $0x130] sm:$0xff]   ;;  %v1129_v19 = vld [vmem:[%s1417_s1 + $0x178] sm:$0xff]  }
  0x16   :  { %979 = vmatprep.subr.bf16.mxu1 %v1088_v21  ;;  %v1128_v20 = vld [vmem:[%s1417_s1 + $0x1b0] sm:$0xff]   ;;  %v1130_v21 = vld [vmem:[%s1417_s1 + $0x1f8] sm:$0xff]  }
  0x17   :  { %v1131_v22 = vld [vmem:[%s1417_s1 + $0x138] sm:$0xff]   ;;  %v1135_v29 = vld [vmem:[%s1419_s3 + $0x10] sm:$0xff]  }
  0x18   :  { %958 = vmatpush3.bf16.msra.mxu0 %v1089_v25  ;;  %v1132_v23 = vld [vmem:[%s1417_s1 + $0x1b8] sm:$0xff]   ;;  %v73_v25 = vpack.c.bf16 %v1286_v50, %v1286_v50 }
  0x19   :  { %980 = vmatpush3.bf16.msra.mxu1 %v1090_v26  ;;  %959 = vmatprep.subr.bf16.mxu0 %v1091_v27  ;;  %v1142_v26 = vmov 0.0   ;;  %v1133_v27 = vld [vmem:[%s1419_s3] sm:$0xff]   ;;  %v1136_v30 = vld [vmem:[%s1419_s3 + $0x18] sm:$0xff]  }
  0x1a   :  { %981 = vmatprep.subr.bf16.mxu1 %v1092_v28  ;;  %v1134_v28 = vld [vmem:[%s1419_s3 + $0x8] sm:$0xff]  }
  0x1c   :  { %960 = vmatpush3.bf16.msra.mxu0 %v1093_v31  ;;  %v1137_v31 = vld [vmem:[%s1419_s3 + $0x20] sm:$0xff]  }
  0x1d   :  { %982 = vmatpush3.bf16.msra.mxu1 %v1094_v32  ;;  %961 = vmatprep.subr.bf16.mxu0 %v1095_v33  ;;  %v1138_v32 = vld [vmem:[%s1419_s3 + $0x28] sm:$0xff]   ;;  %v1139_v33 = vld [vmem:[%s1419_s3 + $0x30] sm:$0xff]  }
  0x1e   :  { %983 = vmatprep.subr.bf16.mxu1 %v1096_v34  ;;  %v1140_v34 = vld [vmem:[%s1419_s3 + $0x38] sm:$0xff]  }
  0x20   :  { %962 = vmatpush3.bf16.msra.mxu0 %v1097_v36  ;;  %v873_v36 = vld [vmem:[%s1420_s2] ss:$0 sm:$0xff] }
  0x21   :  { %984 = vmatpush3.bf16.msra.mxu1 %v1098_v37  ;;  %991 = vmatprep.subr.bf16.mxu0 %v1101_v43 }
  0x22   :  { %1013 = vmatprep.subr.bf16.mxu1 %v1102_v45 }
  0x23   :  { %627 = vmatmul.mubr.bf16.vlgmr.msra.gmra.mrb[0].mxu0 %v67_v49 }
  0x24   :  { %992 = vmatpush3.bf16.msra.mxu0 %v1103_v53  ;;  %667 = vmatmul.mubr.bf16.vlgmr.msra.gmra.mrb[0].mxu1 %v69_v54 }
  0x25   :  { %993 = vmatprep.subr.bf16.mxu0 %v1105_v55  ;;  %1014 = vmatpush3.bf16.msra.mxu1 %v1104_v58 }
  0x26   :  { %706 = vmatprep.mubr.bf16.mxu0 %v72_v59  ;;  %1015 = vmatprep.subr.bf16.mxu1 %v1106_v60 }
  0x27   :  { %746 = vmatprep.mubr.bf16.mxu1 %v74_v61 }
  0x28   :  { %994 = vmatpush3.bf16.msra.mxu0 %v1107_v62  ;;  %v938_v62 = vld [vmem:[%s1421_s4] ss:$0 sm:$0xff] }
  0x29   :  { %995 = vmatprep.subr.bf16.mxu0 %v1109_v63  ;;  %1016 = vmatpush3.bf16.msra.mxu1 %v1108_v0 }
  0x2a   :  { %1017 = vmatprep.subr.bf16.mxu1 %v1110_v1 }
  0x2c   :  { %996 = vmatpush3.bf16.msra.mxu0 %v1111_v2 }
  0x2d   :  { %997 = vmatprep.subr.bf16.mxu0 %v1113_v3  ;;  %1018 = vmatpush3.bf16.msra.mxu1 %v1112_v4 }
  0x2e   :  { %1019 = vmatprep.subr.bf16.mxu1 %v1114_v5 }
  0x30   :  { %998 = vmatpush3.bf16.msra.mxu0 %v1115_v6 }
  0x31   :  { %999 = vmatprep.subr.bf16.mxu0 %v1117_v7  ;;  %1020 = vmatpush3.bf16.msra.mxu1 %v1116_v8 }
  0x32   :  { %1021 = vmatprep.subr.bf16.mxu1 %v1118_v9 }
  0x34   :  { %1000 = vmatpush3.bf16.msra.mxu0 %v1119_v10 }
  0x35   :  { %1001 = vmatprep.subr.bf16.mxu0 %v1121_v11  ;;  %1022 = vmatpush3.bf16.msra.mxu1 %v1120_v12 }
  0x36   :  { %1023 = vmatprep.subr.bf16.mxu1 %v1122_v13 }
  0x38   :  { %1002 = vmatpush3.bf16.msra.mxu0 %v1123_v14 }
  0x39   :  { %1003 = vmatprep.subr.bf16.mxu0 %v1125_v15  ;;  %1024 = vmatpush3.bf16.msra.mxu1 %v1124_v16 }
  0x3a   :  { %1025 = vmatprep.subr.bf16.mxu1 %v1126_v17 }
  0x3c   :  { %1004 = vmatpush3.bf16.msra.mxu0 %v1127_v18 }
  0x3d   :  { %1005 = vmatprep.subr.bf16.mxu0 %v1129_v19  ;;  %1026 = vmatpush3.bf16.msra.mxu1 %v1128_v20 }
  0x3e   :  { %1027 = vmatprep.subr.bf16.mxu1 %v1130_v21 }
  0x40   :  { %1006 = vmatpush3.bf16.msra.mxu0 %v1131_v22 }
  0x41   :  { %1028 = vmatpush3.bf16.msra.mxu1 %v1132_v23  ;;  %1044 = vmatprep.subr.bf16.mxu0 %v1142_v26 }
  0x43   :  { %707 = vmatmul.mubr.bf16.vlgmr.msra.gmra.mrb[4].mxu0 %v71_v24 }
  0x44   :  { %747 = vmatmul.mubr.bf16.vlgmr.msra.gmra.mrb[4].mxu1 %v73_v25  ;;  %1045 = vmatpush3.bf16.msra.mxu0 %v1133_v27 }
  0x45   :  { %1046 = vmatprep.subr.bf16.mxu0 %v1142_v26  ;;  %1060 = vmatprep.mubr.msk.bf16.mxu0 %vm1143_vm0, %v1142_v26 }
  0x48   :  { %1047 = vmatpush3.bf16.msra.mxu0 %v1134_v28 }
  0x49   :  { %1048 = vmatprep.subr.bf16.mxu0 %v1142_v26 }
  0x4c   :  { %1049 = vmatpush3.bf16.msra.mxu0 %v1135_v29 }
  0x4d   :  { %1050 = vmatprep.subr.bf16.mxu0 %v1142_v26 }
  0x50   :  { %1051 = vmatpush3.bf16.msra.mxu0 %v1136_v30 }
  0x51   :  { %1052 = vmatprep.subr.bf16.mxu0 %v1142_v26 }
  0x54   :  { %1053 = vmatpush3.bf16.msra.mxu0 %v1137_v31 }
  0x55   :  { %1054 = vmatprep.subr.bf16.mxu0 %v1142_v26 }
  0x58   :  { %1055 = vmatpush3.bf16.msra.mxu0 %v1138_v32 }
  0x59   :  { %1056 = vmatprep.subr.bf16.mxu0 %v1142_v26 }
  0x5c   :  { %1057 = vmatpush3.bf16.msra.mxu0 %v1139_v33 }
  0x5d   :  { %1058 = vmatprep.subr.bf16.mxu0 %v1142_v26 }
  0x60   :  { %1059 = vmatpush3.bf16.msra.mxu0 %v1140_v34 }
  0xf6   :  { %v963_v35 = vpop.f32.mrb[0].mxu0 }
  0xf7   :  { %v964_v37 = vpop.f32.mrb[1].mxu0  ;;  %v985_v38 = vpop.f32.mrb[0].mxu1 }
  0xf8   :  { %v965_v39 = vadd.f32 %v964_v37, %v963_v35  ;;  %v966_v40 = vpop.f32.mrb[2].mxu0  ;;  %v986_v41 = vpop.f32.mrb[1].mxu1 }
  0xf9   :  { %v967_v42 = vpop.f32.mrb[3].mxu0  ;;  %v987_v44 = vadd.f32 %v986_v41, %v985_v38  ;;  %v988_v45 = vpop.f32.mrb[2].mxu1 }
  0xfa   :  { %v629_v43 = vadd.f32 %v965_v39, %v873_v36  ;;  %v989_v46 = vpop.f32.mrb[3].mxu1 }
  0xfc   :  { %v669_v47 = vadd.f32 %v987_v44, %v629_v43 }
 0x116   :  { %v1007_v48 = vpop.f32.mrb[4].mxu0 }
 0x117   :  { %v1008_v49 = vpop.f32.mrb[5].mxu0  ;;  %v1029_v50 = vpop.f32.mrb[4].mxu1 }
 0x118   :  { %v1009_v51 = vadd.f32 %v1008_v49, %v1007_v48  ;;  %v1010_v52 = vpop.f32.mrb[6].mxu0  ;;  %v1030_v53 = vpop.f32.mrb[5].mxu1 }
 0x119   :  { %v1011_v54 = vpop.f32.mrb[7].mxu0  ;;  %v1031_v56 = vadd.f32 %v1030_v53, %v1029_v50  ;;  %v1032_v57 = vpop.f32.mrb[6].mxu1 }
 0x11a   :  { %v709_v55 = vadd.f32 %v1009_v51, %v669_v47  ;;  %v1033_v58 = vpop.f32.mrb[7].mxu1 }
 0x11c   :  { %v749_v59 = vadd.f32 %v1031_v56, %v709_v55 }
 0x11e   :  { %v754_v60 = vmax.f32 %v749_v59, 0.0 }
 0x120   :  { %v755_v61 = vpack.c.bf16 %v754_v60, %v754_v60 }
 0x122   :  { %1061 = vmatmul.mubr.bf16.vlgmr.msra.gmra.mrb[8].mxu0 %v755_v61 }
 0x1f5   :  { %v861_v63 = vpop.f32.mrb[8].mxu0 }
 0x1f6   :  { %v862_v0 = vadd.f32 %v938_v62, %v861_v63  ;;  %v1062_v1 = vpop.f32.mrb[9].mxu0 }
 0x1f7   :  { %v864_v2 = vpop.f32.mrb[10].mxu0 }
 0x1f8   :  { %v867_v3 = vpack.c.bf16 %v862_v0, %v862_v0  ;;  %v1063_v4 = vpop.f32.mrb[11].mxu0 }
 0x1fa   :  { %868 = vst [vmem:[%s1422_s5] sm:$0x1] %v867_v3 }

</bundles_post_ra>
